<compile_context>
chip_gen: v6e
topology: v6e:2x2x1
jax: 0.10.0
libtpu: 0.0.40
codegen_flags: <defaults>
</compile_context>

<pallas_src>
import jax
import jax.numpy as jnp
from jax.experimental import pallas as pl
from jax.experimental.pallas import tpu as pltpu


def _round_up(x, m):
    return ((x + m - 1) // m) * m


def _divisor_tile(n, caps=(512, 384, 256, 128)):
    """Largest tile in `caps` that divides n (n is a multiple of 128)."""
    for t in caps:
        if t <= n and n % t == 0:
            return t
    return n


def _vmem_limit_bytes():
    """Per-generation scoped-VMEM limit: ~3/4 of physical, capped at 100 MiB."""
    try:
        cap = pltpu.get_tpu_info().vmem_capacity_bytes
        return int(min(cap * 3 // 4, 100 * 1024 * 1024))
    except Exception:
        return 64 * 1024 * 1024


# --------------------------------------------------------------------------- #
# Kernel 1: first-layer feature transform  XW = X @ W1   (row/K tiled, bf16 out)
# --------------------------------------------------------------------------- #
def _xw_kernel(x_ref, w_ref, o_ref, acc_ref):
    k = pl.program_id(1)

    @pl.when(k == 0)
    def _():
        acc_ref[...] = jnp.zeros_like(acc_ref)

    acc_ref[...] += jnp.dot(x_ref[...], w_ref[...],
                            preferred_element_type=jnp.float32)

    @pl.when(k == pl.num_programs(1) - 1)
    def _():
        o_ref[...] = acc_ref[...].astype(o_ref.dtype)


def _dense_transform(x, w, tm, tfk, out_dtype, vmem_limit):
    np_, fp = x.shape
    hp = w.shape[1]
    return pl.pallas_call(
        _xw_kernel,
        out_shape=jax.ShapeDtypeStruct((np_, hp), out_dtype),
        grid=(np_ // tm, fp // tfk),
        in_specs=[pl.BlockSpec((tm, tfk), lambda i, k: (i, k)),
                  pl.BlockSpec((tfk, hp), lambda i, k: (k, 0))],
        out_specs=pl.BlockSpec((tm, hp), lambda i, k: (i, 0)),
        scratch_shapes=[pltpu.VMEM((tm, hp), jnp.float32)],
        compiler_params=pltpu.CompilerParams(
            dimension_semantics=("parallel", "arbitrary"),
            vmem_limit_bytes=vmem_limit),
    )(x, w)


# --------------------------------------------------------------------------- #
# Kernel 2a: GCN aggregation (last layer)  H = relu(A_norm @ XW + b)
#   1-D row grid, full-K A slab, XW resident (constant-index block), f32 out.
# --------------------------------------------------------------------------- #
def _agg_relu_kernel(a_ref, xw_ref, b_ref, o_ref):
    acc = jnp.dot(a_ref[...], xw_ref[...], preferred_element_type=jnp.float32)
    o_ref[...] = jnp.maximum(acc + b_ref[...], 0.0)


def _gcn_aggregate(a, xw, b, tm, vmem_limit):
    # TODO(synk): K-tile the node dim (grid=(rows, k)) when the (tm, Np) A slab
    # plus resident XW no longer fit the per-generation VMEM budget.
    np_ = a.shape[0]
    hp = xw.shape[1]
    return pl.pallas_call(
        _agg_relu_kernel,
        out_shape=jax.ShapeDtypeStruct((np_, hp), jnp.float32),
        grid=(np_ // tm,),
        in_specs=[pl.BlockSpec((tm, np_), lambda i: (i, 0)),
                  pl.BlockSpec((np_, hp), lambda i: (0, 0)),
                  pl.BlockSpec((1, hp), lambda i: (0, 0))],
        out_specs=pl.BlockSpec((tm, hp), lambda i: (i, 0)),
        compiler_params=pltpu.CompilerParams(
            dimension_semantics=("parallel",),
            vmem_limit_bytes=vmem_limit),
    )(a, xw, b)


# --------------------------------------------------------------------------- #
# Kernel 2b: fused GCN aggregation + next-layer transform
#   XW_next = relu(A_norm @ XW + b) @ W_next   (bf16 out)
# --------------------------------------------------------------------------- #
def _agg_relu_xw_kernel(a_ref, xw_ref, b_ref, wn_ref, o_ref):
    acc = jnp.dot(a_ref[...], xw_ref[...], preferred_element_type=jnp.float32)
    h = jnp.maximum(acc + b_ref[...], 0.0).astype(wn_ref.dtype)
    o_ref[...] = jnp.dot(h, wn_ref[...],
                         preferred_element_type=jnp.float32).astype(o_ref.dtype)


def _gcn_aggregate_fused(a, xw, b, w_next, tm, vmem_limit):
    np_ = a.shape[0]
    hp = xw.shape[1]
    return pl.pallas_call(
        _agg_relu_xw_kernel,
        out_shape=jax.ShapeDtypeStruct((np_, hp), xw.dtype),
        grid=(np_ // tm,),
        in_specs=[pl.BlockSpec((tm, np_), lambda i: (i, 0)),
                  pl.BlockSpec((np_, hp), lambda i: (0, 0)),
                  pl.BlockSpec((1, hp), lambda i: (0, 0)),
                  pl.BlockSpec((hp, hp), lambda i: (0, 0))],
        out_specs=pl.BlockSpec((tm, hp), lambda i: (i, 0)),
        compiler_params=pltpu.CompilerParams(
            dimension_semantics=("parallel",),
            vmem_limit_bytes=vmem_limit),
    )(a, xw, b, w_next)


# --------------------------------------------------------------------------- #
# Kernel 3: pooling (P @ H, K-tiled) + sMRI MLP + final Linear
# --------------------------------------------------------------------------- #
def _head_kernel(p_ref, h_ref, sm_ref, wsm_ref, bsm_ref,
                 wfg_ref, wfs_ref, bf_ref, out_ref, acc_ref):
    k = pl.program_id(0)

    @pl.when(k == 0)
    def _():
        acc_ref[...] = jnp.zeros_like(acc_ref)

    acc_ref[...] += jnp.dot(p_ref[...], h_ref[...],
                            preferred_element_type=jnp.float32)

    @pl.when(k == pl.num_programs(0) - 1)
    def _():
        s = jnp.dot(sm_ref[...], wsm_ref[...],
                    preferred_element_type=jnp.float32) + bsm_ref[...]
        s = jnp.maximum(s, 0.0)
        out_ref[...] = (jnp.dot(acc_ref[...], wfg_ref[...],
                                preferred_element_type=jnp.float32)
                        + jnp.dot(s, wfs_ref[...],
                                  preferred_element_type=jnp.float32)
                        + bf_ref[...])


def _pool_and_head(P, h, sm, wsm, bsm, wfg, wfs, bf, tk, vmem_limit):
    B, np_ = P.shape
    hp = h.shape[1]
    sp = sm.shape[1]
    shp = wsm.shape[1]
    cp = wfg.shape[1]
    return pl.pallas_call(
        _head_kernel,
        out_shape=jax.ShapeDtypeStruct((B, cp), jnp.float32),
        grid=(np_ // tk,),
        in_specs=[pl.BlockSpec((B, tk), lambda k: (0, k)),
                  pl.BlockSpec((tk, hp), lambda k: (k, 0)),
                  pl.BlockSpec((B, sp), lambda k: (0, 0)),
                  pl.BlockSpec((sp, shp), lambda k: (0, 0)),
                  pl.BlockSpec((1, shp), lambda k: (0, 0)),
                  pl.BlockSpec((hp, cp), lambda k: (0, 0)),
                  pl.BlockSpec((shp, cp), lambda k: (0, 0)),
                  pl.BlockSpec((1, cp), lambda k: (0, 0))],
        out_specs=pl.BlockSpec((B, cp), lambda k: (0, 0)),
        scratch_shapes=[pltpu.VMEM((B, hp), jnp.float32)],
        compiler_params=pltpu.CompilerParams(
            dimension_semantics=("arbitrary",),
            vmem_limit_bytes=vmem_limit),
    )(P, h, sm, wsm, bsm, wfg, wfs, bf)


# --------------------------------------------------------------------------- #
# Forward pass
# --------------------------------------------------------------------------- #
def model_forward(params, x, edge_index, edge_weight, batch, smri_data,
                  num_graphs, *, matmul_dtype=jnp.bfloat16):
    """GCN forward.  Default matmul_dtype=bf16: operands of the bandwidth-bound
    A_norm aggregation (and XW / layer weights) stream as bf16 while every
    matmul accumulates in f32 (preferred_element_type).  Pass jnp.float32 to
    reproduce the PyTorch f32 numerics exactly."""
    x = x.astype(jnp.float32)
    edge_weight = edge_weight.astype(jnp.float32)
    smri_data = smri_data.astype(jnp.float32)

    N, nfeat = x.shape
    nhid = params["W1"].shape[1]
    nclass = params["bf"].shape[-1]
    smri_in, smri_hid = params["Wsm"].shape

    vmem = _vmem_limit_bytes()

    # ---- padded dims (lane/sublane aligned) and tile sizes -------------------
    Np = _round_up(N, 128)
    Fp = _round_up(nfeat, 128)
    Hp = _round_up(nhid, 128)
    Sp = _round_up(smri_in, 128)
    SHp = _round_up(smri_hid, 128)
    Cp = _round_up(nclass, 128)

    # Row tile: keep >= 2 grid steps whenever Np >= 256 so the "parallel" axis
    # can feed both v7x TensorCores; v5e/v6e are single-TC so this is free.
    TM = 256 if (Np >= 512 and Np % 256 == 0) else 128
    TFK = _divisor_tile(Fp)          # feature-reduction tile for X @ W1
    TKH = _divisor_tile(Np)          # node-reduction tile for the pooling head

    # ---- glue: dense normalized adjacency built directly at padded size -----
    # (PyG gcn_norm semantics, add_self_loops=True)
    src, tgt = edge_index[0], edge_index[1]
    idx = jnp.arange(N)
    A = jnp.zeros((Np, Np), jnp.float32).at[tgt, src].add(edge_weight)
    A = A.at[idx, idx].add(1.0)                                   # self loops
    deg = A.sum(axis=1)
    dinv = jnp.where(deg > 0, jax.lax.rsqrt(deg), 0.0)
    A = (dinv[:, None] * A * dinv[None, :]).astype(matmul_dtype)
    # TODO(synk): for large sparse connectomes, replace the dense A_norm with a
    # scalar-prefetch CSR SpMM instead of materializing an Np x Np matrix.

    # ---- glue: mean-pooling matrix P[b, n] = (batch[n] == b) / count[b] -----
    onehot = (batch[None, :] == jnp.arange(num_graphs)[:, None]).astype(jnp.float32)
    counts = jnp.maximum(onehot.sum(axis=1, keepdims=True), 1.0)
    P = jnp.pad(onehot / counts, ((0, 0), (0, Np - N)))

    # ---- zero padding (padded rows/cols of A and P are zero, so padded node
    #      rows never contaminate real outputs) -------------------------------
    xp = jnp.pad(x, ((0, Np - N), (0, Fp - nfeat))).astype(matmul_dtype)
    W1 = jnp.pad(params["W1"], ((0, Fp - nfeat), (0, Hp - nhid))).astype(matmul_dtype)
    b1 = jnp.pad(params["b1"], ((0, 0), (0, Hp - nhid)))
    Wm = [jnp.pad(w, ((0, Hp - nhid), (0, Hp - nhid))).astype(matmul_dtype)
          for w in params["Wm"]]
    bm = [jnp.pad(b, ((0, 0), (0, Hp - nhid))) for b in params["bm"]]
    smp = jnp.pad(smri_data, ((0, 0), (0, Sp - smri_in)))
    Wsm = jnp.pad(params["Wsm"], ((0, Sp - smri_in), (0, SHp - smri_hid)))
    bsm = jnp.pad(params["bsm"], ((0, 0), (0, SHp - smri_hid)))
    Wfg = jnp.pad(params["Wfg"], ((0, Hp - nhid), (0, Cp - nclass)))
    Wfs = jnp.pad(params["Wfs"], ((0, SHp - smri_hid), (0, Cp - nclass)))
    bf = jnp.pad(params["bf"], ((0, 0), (0, Cp - nclass)))

    layer_ws = [W1] + Wm            # bf16 (matmul_dtype)
    layer_bs = [b1] + bm            # f32
    L = len(layer_ws)

    # ---- GCN layers ----------------------------------------------------------
    # First layer's feature transform (feature dim differs), bf16 output.
    xw = _dense_transform(xp, layer_ws[0], TM, TFK, matmul_dtype, vmem)
    # Each intermediate aggregation fuses the NEXT layer's transform into its
    # epilogue, so each layer costs exactly one pallas_call / one H pass.
    for l in range(L - 1):
        xw = _gcn_aggregate_fused(A, xw, layer_bs[l], layer_ws[l + 1], TM, vmem)
    # Last aggregation keeps H in f32 for the (tiny, read-once) head.
    h = _gcn_aggregate(A, xw, layer_bs[L - 1], TM, vmem)

    # ---- pooling + sMRI MLP + final Linear epilogue --------------------------
    out = _pool_and_head(P, h, smp, Wsm, bsm, Wfg, Wfs, bf, TKH, vmem)
    return out[:, :nclass]


# --------------------------------------------------------------------------- #
# Pure-JAX reference (for correctness check)
# --------------------------------------------------------------------------- #
def reference_forward(params, x, edge_index, edge_weight, batch, smri_data,
                      num_graphs):
    HI = jax.lax.Precision.HIGHEST
    x = x.astype(jnp.float32)
    N = x.shape[0]
    src, tgt = edge_index[0], edge_index[1]
    A = jnp.zeros((N, N), jnp.float32).at[tgt, src].add(
        edge_weight.astype(jnp.float32))
    A = A + jnp.eye(N, dtype=jnp.float32)
    deg = A.sum(axis=1)
    dinv = jnp.where(deg > 0, jax.lax.rsqrt(deg), 0.0)
    A = dinv[:, None] * A * dinv[None, :]

    h = jnp.maximum(
        jnp.dot(A, jnp.dot(x, params["W1"], precision=HI), precision=HI)
        + params["b1"], 0.0)
    for W, b in zip(params["Wm"], params["bm"]):
        h = jnp.maximum(
            jnp.dot(A, jnp.dot(h, W, precision=HI), precision=HI) + b, 0.0)

    onehot = (batch[None, :] == jnp.arange(num_graphs)[:, None]).astype(jnp.float32)
    P = onehot / jnp.maximum(onehot.sum(axis=1, keepdims=True), 1.0)
    g = jnp.dot(P, h, precision=HI)
    s = jnp.maximum(
        jnp.dot(smri_data.astype(jnp.float32), params["Wsm"], precision=HI)
        + params["bsm"], 0.0)
    return (jnp.dot(g, params["Wfg"], precision=HI)
            + jnp.dot(s, params["Wfs"], precision=HI) + params["bf"])


# --------------------------------------------------------------------------- #
# Parameters (shapes match the PyTorch module; dropout is identity in eval)
# --------------------------------------------------------------------------- #
def init_params(key, nfeat, nhid, nclass, num_layers,
                smri_input_size, smri_hidden_size):
    num_mid = max(num_layers - 2, 0)
    ks = jax.random.split(key, 8 + 2 * num_mid)
    scale = 0.1
    Wm = [scale * jax.random.normal(ks[8 + 2 * l], (nhid, nhid), jnp.float32)
          for l in range(num_mid)]
    bm = [scale * jax.random.normal(ks[9 + 2 * l], (1, nhid), jnp.float32)
          for l in range(num_mid)]
    Wf = scale * jax.random.normal(ks[6], (nhid + smri_hidden_size, nclass),
                                   jnp.float32)
    return {
        # GCNConv(nfeat, nhid): lin weight [nfeat, nhid], bias [nhid]
        "W1": scale * jax.random.normal(ks[0], (nfeat, nhid), jnp.float32),
        "b1": scale * jax.random.normal(ks[1], (1, nhid), jnp.float32),
        # intermediate GCNConv(nhid, nhid) stack (lists -> clean num_mid==0 case)
        "Wm": Wm,
        "bm": bm,
        # smri_mlp Linear(smri_input_size, smri_hidden_size)
        "Wsm": scale * jax.random.normal(ks[4], (smri_input_size, smri_hidden_size),
                                         jnp.float32),
        "bsm": scale * jax.random.normal(ks[5], (1, smri_hidden_size), jnp.float32),
        # final Linear(nhid + smri_hidden_size, nclass), split for implicit concat
        "Wfg": Wf[:nhid],
        "Wfs": Wf[nhid:],
        "bf": scale * jax.random.normal(ks[7], (1, nclass), jnp.float32),
    }


if __name__ == "__main__":
    # Small, module-consistent shapes.
    nfeat, nhid, nclass = 8, 16, 4
    num_layers = 3                    # -> 1 intermediate GCN layer
    smri_input_size, smri_hidden_size = 8, 16
    num_graphs, nodes_per_graph = 2, 8
    N = num_graphs * nodes_per_graph
    E = 40

    key = jax.random.PRNGKey(0)
    kx, ke, kw, ks, kp = jax.random.split(key, 5)

    x = jax.random.normal(kx, (N, nfeat), jnp.float32)
    edge_index = jax.random.randint(ke, (2, E), 0, N, dtype=jnp.int32)
    edge_weight = jax.random.uniform(kw, (E,), jnp.float32, minval=0.1, maxval=1.0)
    batch = jnp.repeat(jnp.arange(num_graphs, dtype=jnp.int32), nodes_per_graph)
    smri_data = jax.random.normal(ks, (num_graphs, smri_input_size), jnp.float32)

    params = init_params(kp, nfeat, nhid, nclass, num_layers,
                         smri_input_size, smri_hidden_size)

    out = model_forward(params, x, edge_index, edge_weight, batch, smri_data,
                        num_graphs)
    jax.block_until_ready(out)
    assert out.shape == (num_graphs, nclass)

    ref = reference_forward(params, x, edge_index, edge_weight, batch,
                            smri_data, num_graphs)
    assert bool(jnp.allclose(out, ref, rtol=2e-2, atol=2e-2))

    print("KERNEL_OK")
</pallas_src>

<mosaic_0001>
module attributes {stable_mosaic.version = 11 : i64} {
  func.func @_xw_kernel(%arg0: i32, %arg1: i32, %arg2: memref<128x128xbf16, #tpu.memory_space<vmem>>, %arg3: memref<128x128xbf16, #tpu.memory_space<vmem>>, %arg4: memref<128x128xbf16, #tpu.memory_space<vmem>>, %arg5: memref<128x128xf32, #tpu.memory_space<vmem>>) attributes {dimension_semantics = [#tpu.dimension_semantics<parallel>, #tpu.dimension_semantics<arbitrary>], iteration_bounds = array<i64: 1, 1>, scalar_prefetch = 0 : i64, scratch_operands = 1 : i64, tpu.core_type = #tpu.core_type<tc>, window_params = [{transform_indices = @transform_0, window_bounds = array<i64: 128, 128>}, {transform_indices = @transform_1, window_bounds = array<i64: 128, 128>}, {transform_indices = @transform_2, window_bounds = array<i64: 128, 128>}]} {
    %c0_i32 = arith.constant 0 : i32
    %0 = arith.cmpi eq, %arg1, %c0_i32 : i32
    %1 = arith.extui %0 : i1 to i32
    %c0_i32_0 = arith.constant 0 : i32
    %2 = arith.cmpi ne, %1, %c0_i32_0 : i32
    scf.if %2 {
      %cst_10 = arith.constant 0.000000e+00 : f32
      %12 = vector.broadcast %cst_10 : f32 to vector<128x128xf32>
      %c0_11 = arith.constant 0 : index
      %c0_12 = arith.constant 0 : index
      %13 = vector.load %arg5[%c0_11, %c0_12] : memref<128x128xf32, #tpu.memory_space<vmem>>, vector<128x128xf32>
      tpu.vector_store %arg5[%c0_11, %c0_12], %12 {strides = array<i32>} : memref<128x128xf32, #tpu.memory_space<vmem>>, vector<128x128xf32>,
    } else {
    }
    %c0 = arith.constant 0 : index
    %c0_1 = arith.constant 0 : index
    %3 = vector.load %arg5[%c0, %c0_1] : memref<128x128xf32, #tpu.memory_space<vmem>>, vector<128x128xf32>
    %c0_2 = arith.constant 0 : index
    %c0_3 = arith.constant 0 : index
    %4 = vector.load %arg2[%c0_2, %c0_3] : memref<128x128xbf16, #tpu.memory_space<vmem>>, vector<128x128xbf16>
    %c0_4 = arith.constant 0 : index
    %c0_5 = arith.constant 0 : index
    %5 = vector.load %arg3[%c0_4, %c0_5] : memref<128x128xbf16, #tpu.memory_space<vmem>>, vector<128x128xbf16>
    %cst = arith.constant dense<0.000000e+00> : vector<128x128xf32>
    %6 = tpu.matmul %4, %5, %cst {dimension_numbers = #tpu.dot_dimension_numbers<[1], [0], [0], [1], [0, 0, 1, 1], [], []>} : vector<128x128xbf16>, vector<128x128xbf16>, vector<128x128xf32> -> vector<128x128xf32>
    %7 = arith.addf %3, %6 : vector<128x128xf32>
    %c0_6 = arith.constant 0 : index
    %c0_7 = arith.constant 0 : index
    %8 = vector.load %arg5[%c0_6, %c0_7] : memref<128x128xf32, #tpu.memory_space<vmem>>, vector<128x128xf32>
    tpu.vector_store %arg5[%c0_6, %c0_7], %7 {strides = array<i32>} : memref<128x128xf32, #tpu.memory_space<vmem>>, vector<128x128xf32>,
    %c0_i32_8 = arith.constant 0 : i32
    %9 = arith.cmpi eq, %arg1, %c0_i32_8 : i32
    %10 = arith.extui %9 : i1 to i32
    %c0_i32_9 = arith.constant 0 : i32
    %11 = arith.cmpi ne, %10, %c0_i32_9 : i32
    scf.if %11 {
      %c0_10 = arith.constant 0 : index
      %c0_11 = arith.constant 0 : index
      %12 = vector.load %arg5[%c0_10, %c0_11] : memref<128x128xf32, #tpu.memory_space<vmem>>, vector<128x128xf32>
      %13 = arith.truncf %12 : vector<128x128xf32> to vector<128x128xbf16>
      %c0_12 = arith.constant 0 : index
      %c0_13 = arith.constant 0 : index
      %14 = vector.load %arg4[%c0_12, %c0_13] : memref<128x128xbf16, #tpu.memory_space<vmem>>, vector<128x128xbf16>
      tpu.vector_store %arg4[%c0_12, %c0_13], %13 {strides = array<i32>} : memref<128x128xbf16, #tpu.memory_space<vmem>>, vector<128x128xbf16>,
    } else {
    }
    return
  }
  func.func @transform_0(%arg0: i32, %arg1: i32) -> (i32, i32) {
    %c0_i32 = arith.constant 0 : i32
    return %arg0, %arg1 : i32, i32
  }
  func.func @transform_1(%arg0: i32, %arg1: i32) -> (i32, i32) {
    %c0_i32 = arith.constant 0 : i32
    %c0_i32_0 = arith.constant 0 : i32
    return %arg1, %c0_i32 : i32, i32
  }
  func.func @transform_2(%arg0: i32, %arg1: i32) -> (i32, i32) {
    %c0_i32 = arith.constant 0 : i32
    %c0_i32_0 = arith.constant 0 : i32
    return %arg0, %c0_i32 : i32, i32
  }
}

</mosaic_0001>

<bundles_post_ra>
// kernel: tpu_custom_call.1
= control target key start
LH: loop header
LB: loop body
LE: loop exit
PB: predicated region body
PF: predicated region fallthrough
CT: control target
= control target key end

     0   :  { %7 = vsyncpa [#allocation4], 0  ;;  %s735_s0 = inlined_call_operand.hbm [shape: bf16[128,128], index: 0, kind: input, shape index: {}]   ;;  %s736_s1 = inlined_call_operand.hbm [shape: bf16[128,128], index: 1, kind: input, shape index: {}]   ;;  %s737_s2 = inlined_call_operand.hbm [shape: bf16[128,128], index: 2, kind: output, shape index: {}]  }
   0x1   :  { %8 = vsyncpa [#allocation7], 0 }
   0x2   :  { %9 = vsyncpa [#allocation5], 0  ;;  %s697_s9 = smov [#allocation3]  }
   0x3   :  { %s15_s10 = sshll.u32 %s697_s9, 4  ;;  %s16_s10 = int_to_ptr.vmem [resolvable:$true] %s15_s10 }
   0x4   :  { %s639_s11 = scalar_lea.vmem %s16_s10, 1024  ;;  %p644_p1 = scmp.lt.s32.totalorder %s16_s10, %s16_s10 }
   0x5   :  { %p640_p0 = scmp.ne.s32.totalorder %s16_s10, %s639_s11  ;;  %p645_p2 = scmp.lt.s32.totalorder %s639_s11, %s639_s11 }
   0x7   :  { %p646_p3 = por %p645_p2, %p644_p1 }
   0x9   :  { %p647_p4 = pnand %p646_p3, %p640_p0 }
   0xb   :  { %650 = shalt.err (!%p647_p4)
}
   0xc   :  { %s698_s12 = smov 64   ;;  %s699_s13 = smov 4  }
   0xd   :  { %21 = dma.hbm_to_vmem [thread:$0]  %s735_s0, 1024, %s16_s10, [#allocation4], %s698_s12, %s698_s12, %s699_s13  }
   0xe   :  { %s700_s16 = smov [#allocation6]  }
   0xf   :  { %s27_s17 = sshll.u32 %s700_s16, 4  ;;  %s28_s17 = int_to_ptr.vmem [resolvable:$true] %s27_s17 }
  0x10   :  { %s659_s18 = scalar_lea.vmem %s28_s17, 1024  ;;  %p664_p6 = scmp.lt.s32.totalorder %s28_s17, %s28_s17 }
  0x11   :  { %p660_p5 = scmp.ne.s32.totalorder %s28_s17, %s659_s18  ;;  %p665_p7 = scmp.lt.s32.totalorder %s659_s18, %s659_s18 }
  0x13   :  { %p666_p8 = por %p665_p7, %p664_p6 }
  0x15   :  { %p667_p9 = pnand %p666_p8, %p660_p5 }
  0x17   :  { %670 = shalt.err (!%p667_p9)
}
  0x18   :  { %33 = dma.hbm_to_vmem [thread:$0]  %s736_s1, 1024, %s28_s17, [#allocation7], %s698_s12, %s698_s12, %s699_s13  }
  0x19   :  { %691 = dma.done.wait [#allocation4], 1024  }
  0x1a   :  { %692 = vsyncadd [#allocation4], 4294966272 }
  0x1b   :  { %693 = dma.done.wait [#allocation7], 1024  }
  0x1c   :  { %694 = vsyncadd [#allocation7], 4294966272  ;;  %v615_v0 = vld [vmem:[#allocation6 + $0x38] sm:$0xff]   ;;  %v616_v1 = vld [vmem:[#allocation6 + $0x30] sm:$0xff]   ;;  %s701_s0 = smov [#allocation8]  }
  0x1d   :  { %562 = vmatprep.subr.bf16.mxu0 %v615_v0  ;;  %594 = vmatprep.subr.bf16.mxu1 %v615_v0  ;;  %v617_v2 = vld [vmem:[#allocation6 + $0x28] sm:$0xff]   ;;  %v618_v3 = vld [vmem:[#allocation6 + $0x20] sm:$0xff]   ;;  %v619_v6 = vld [vmem:[#allocation6 + $0x18] sm:$0xff]   ;;  %s438_s1 = sshll.u32 %s701_s0, 4  ;;  %s439_s1 = int_to_ptr.vmem [resolvable:$true] %s438_s1 }
  0x1e   :  { %563 = vmatpush3.bf16.msra.mxu0 %v615_v0  ;;  %602 = vmatpush3.bf16.msra.mxu1 %v615_v0  ;;  %v623_v4 = vld [vmem:[#allocation3] sm:$0xff]   ;;  %v620_v7 = vld [vmem:[#allocation6 + $0x10] sm:$0xff]   ;;  %v621_v8 = vld [vmem:[#allocation6 + $0x8] sm:$0xff]   ;;  %s671_s21 = scalar_lea.vmem %s439_s1, 1024  ;;  %p676_p11 = scmp.lt.s32.totalorder %s439_s1, %s439_s1 }
  0x1f   :  { %564 = vmatprep.subr.bf16.mxu0 %v616_v1  ;;  %595 = vmatprep.subr.bf16.mxu1 %v616_v1  ;;  %v624_v5 = vld [vmem:[#allocation3 + $0x20] sm:$0xff]   ;;  %v625_v10 = vld [vmem:[#allocation3 + $0x8] sm:$0xff]   ;;  %v627_v12 = vld [vmem:[#allocation3 + $0x10] sm:$0xff]   ;;  %p672_p10 = scmp.ne.s32.totalorder %s439_s1, %s671_s21  ;;  %p677_p12 = scmp.lt.s32.totalorder %s671_s21, %s671_s21 }
  0x20   :  { %578 = vmatprep.mubr.bf16.mxu0 %v623_v4  ;;  %586 = vmatprep.mubr.bf16.mxu1 %v624_v5  ;;  %v622_v9 = vld [vmem:[#allocation6] sm:$0xff]   ;;  %v626_v11 = vld [vmem:[#allocation3 + $0x28] sm:$0xff]   ;;  %v628_v13 = vld [vmem:[#allocation3 + $0x30] sm:$0xff]  }
  0x21   :  { %v629_v14 = vld [vmem:[#allocation3 + $0x18] sm:$0xff]   ;;  %p678_p13 = por %p677_p12, %p676_p11 }
  0x22   :  { %565 = vmatpush3.bf16.msra.mxu0 %v616_v1  ;;  %603 = vmatpush3.bf16.msra.mxu1 %v616_v1  ;;  %v630_v15 = vld [vmem:[#allocation3 + $0x38] sm:$0xff]  }
  0x23   :  { %566 = vmatprep.subr.bf16.mxu0 %v617_v2  ;;  %596 = vmatprep.subr.bf16.mxu1 %v617_v2  ;;  %p679_p0 = pnand %p678_p13, %p672_p10 }
  0x26   :  { %567 = vmatpush3.bf16.msra.mxu0 %v617_v2  ;;  %604 = vmatpush3.bf16.msra.mxu1 %v617_v2 }
  0x27   :  { %568 = vmatprep.subr.bf16.mxu0 %v618_v3  ;;  %597 = vmatprep.subr.bf16.mxu1 %v618_v3 }
  0x2a   :  { %569 = vmatpush3.bf16.msra.mxu0 %v618_v3  ;;  %605 = vmatpush3.bf16.msra.mxu1 %v618_v3 }
  0x2b   :  { %570 = vmatprep.subr.bf16.mxu0 %v619_v6  ;;  %598 = vmatprep.subr.bf16.mxu1 %v619_v6 }
  0x2e   :  { %571 = vmatpush3.bf16.msra.mxu0 %v619_v6  ;;  %606 = vmatpush3.bf16.msra.mxu1 %v619_v6 }
  0x2f   :  { %572 = vmatprep.subr.bf16.mxu0 %v620_v7  ;;  %599 = vmatprep.subr.bf16.mxu1 %v620_v7 }
  0x32   :  { %573 = vmatpush3.bf16.msra.mxu0 %v620_v7  ;;  %607 = vmatpush3.bf16.msra.mxu1 %v620_v7 }
  0x33   :  { %574 = vmatprep.subr.bf16.mxu0 %v621_v8  ;;  %600 = vmatprep.subr.bf16.mxu1 %v621_v8 }
  0x36   :  { %575 = vmatpush3.bf16.msra.mxu0 %v621_v8  ;;  %608 = vmatpush3.bf16.msra.mxu1 %v621_v8 }
  0x37   :  { %576 = vmatprep.subr.bf16.mxu0 %v622_v9  ;;  %601 = vmatprep.subr.bf16.mxu1 %v622_v9 }
  0x3a   :  { %577 = vmatpush3.bf16.msra.mxu0 %v622_v9  ;;  %609 = vmatpush3.bf16.msra.mxu1 %v622_v9 }
  0x3d   :  { %579 = vmatmul.mubr.bf16.vlgmr.msra.gmra.mxu0 %v625_v10  ;;  %587 = vmatmul.mubr.bf16.vlgmr.msra.gmra.mxu1 %v626_v11 }
  0x3e   :  { %582 = vmatprep.mubr.bf16.mxu0 %v627_v12  ;;  %590 = vmatprep.mubr.bf16.mxu1 %v628_v13 }
  0x45   :  { %583 = vmatmul.mubr.bf16.gmra.mxu0 %v629_v14  ;;  %591 = vmatmul.mubr.bf16.gmra.mxu1 %v630_v15 }
  0xfd   :  { %v580_v16 = vpop.f32.mrf.mxu0  ;;  %v588_v17 = vpop.f32.mrf.mxu1 }
  0xff   :  { %v239_v18 = vpop.f32.mrf.mxu0  ;;  %v271_v19 = vpop.f32.mrf.mxu1 }
 0x101   :  { %v581_v20 = vpop.f32.mrf.mxu0  ;;  %v589_v21 = vpop.f32.mrf.mxu1 }
 0x102   :  { %v507_v22 = vpack.c.bf16 %v581_v20, %v580_v16  ;;  %v527_v23 = vpack.c.bf16 %v589_v21, %v588_v17 }
 0x103   :  { %v242_v24 = vpop.f32.mrf.mxu0  ;;  %v274_v25 = vpop.f32.mrf.mxu1 }
 0x104   :  { %539 = vst [vmem:[#allocation8 + $0x8] sm:$0xff] %v507_v22   ;;  %543 = vst [vmem:[#allocation8 + $0x28] sm:$0xff] %v527_v23   ;;  %v502_v26 = vpack.c.bf16 %v242_v24, %v239_v18  ;;  %v522_v27 = vpack.c.bf16 %v274_v25, %v271_v19 }
 0x105   :  { %v584_v28 = vpop.f32.mrf.mxu0  ;;  %v592_v29 = vpop.f32.mrf.mxu1 }
 0x106   :  { %503 = vst [vmem:[#allocation8] sm:$0xff] %v502_v26   ;;  %542 = vst [vmem:[#allocation8 + $0x20] sm:$0xff] %v522_v27  }
 0x107   :  { %v255_v30 = vpop.f32.mrf.mxu0  ;;  %v287_v31 = vpop.f32.mrf.mxu1 }
 0x109   :  { %v585_v32 = vpop.f32.mrf.mxu0  ;;  %v593_v33 = vpop.f32.mrf.mxu1 }
 0x10a   :  { %v517_v34 = vpack.c.bf16 %v585_v32, %v584_v28  ;;  %v537_v35 = vpack.c.bf16 %v593_v33, %v592_v29 }
 0x10b   :  { %v258_v36 = vpop.f32.mrf.mxu0  ;;  %v290_v37 = vpop.f32.mrf.mxu1 }
 0x10c   :  { %541 = vst [vmem:[#allocation8 + $0x18] sm:$0xff] %v517_v34   ;;  %545 = vst [vmem:[#allocation8 + $0x38] sm:$0xff] %v537_v35   ;;  %v512_v38 = vpack.c.bf16 %v258_v36, %v255_v30  ;;  %v532_v39 = vpack.c.bf16 %v290_v37, %v287_v31 }
 0x10e   :  { %540 = vst [vmem:[#allocation8 + $0x10] sm:$0xff] %v512_v38   ;;  %544 = vst [vmem:[#allocation8 + $0x30] sm:$0xff] %v532_v39  }
 0x10f   :  { %682 = shalt.err (!%p679_p0)
}
 0x110   :  { %444 = dma.vmem_to_hbm [thread:$0]  %s439_s1, 1024, %s737_s2, [#allocation5], %s698_s12, %s698_s12, %s699_s13  }
 0x111   :  { %695 = dma.done.wait [#allocation5], 1024  }
 0x112   :  { %696 = vsyncadd [#allocation5], 4294966272 }
 0x113   :  { %448 = vsyncpa [#allocation4], 1 }
 0x114   :  { %449 = vsyncpa [#allocation7], 1 }
 0x115   :  { %450 = vsyncpa [#allocation5], 1 }

</bundles_post_ra>
